<compile_context>
chip_gen: v7x
topology: tpu7x:2x2x1
jax: 0.10.0
libtpu: 0.0.40
codegen_flags: <defaults>
</compile_context>

<pallas_src>
import math
from functools import partial

import jax
import jax.numpy as jnp
from jax.experimental import pallas as pl
from jax.experimental.pallas import tpu as pltpu

# ---- AWingLoss hyper-parameters (module __init__ defaults) -----------------
OMEGA = 14.0
THETA = 0.5
EPSILON = 1.0
ALPHA = 2.1
USE_WEIGHT_MAP = True
WMAP_W = 10.0
WMAP_THRESH = 0.2

LOG_R = math.log(THETA / EPSILON)   # log(theta/eps), Python constant
R_INV = EPSILON / THETA             # (theta/eps)^-1, Python constant


def _awing_kernel(pred_ref, gt_ref, psum_ref, *, width, n_planes, block_p):
    pred = pred_ref[...].astype(jnp.float32)   # (P, L) lane-dense
    gt = gt_ref[...].astype(jnp.float32)       # (P, L)
    L = gt.shape[-1]

    weight = None
    if USE_WEIGHT_MAP:
        neg = jnp.float32(-3.0e38)
        # (1, L) edge masks built once per block and sublane-broadcast over P.
        # row/col are recovered with f32 math (exact for L < ~2^21), avoiding
        # integer div/rem in the vector path.
        li = jax.lax.broadcasted_iota(jnp.int32, (1, L), 1).astype(jnp.float32)
        rowf = jnp.floor((li + 0.5) * (1.0 / width))
        colf = li - rowf * width
        m_left = colf > 0.5                       # col >= 1
        m_right = colf < (width - 1) - 0.5        # col <= W-2
        m_up = rowf > 0.5                         # row >= 1
        m_down = rowf < (L // width - 1) - 0.5    # row <= H-2

        # Separable 3x3 max-pool (stride 1, -inf padding) as 4 lane rolls.
        left = jnp.where(m_left, pltpu.roll(gt, shift=1, axis=1), neg)
        right = jnp.where(m_right, pltpu.roll(gt, shift=L - 1, axis=1), neg)
        rmax = jnp.maximum(gt, jnp.maximum(left, right))
        up = jnp.where(m_up, pltpu.roll(rmax, shift=width, axis=1), neg)
        down = jnp.where(m_down, pltpu.roll(rmax, shift=L - width, axis=1), neg)
        dilate = jnp.maximum(rmax, jnp.maximum(up, down))
        weight = jnp.where(dilate < WMAP_THRESH, 1.0, 1.0 + WMAP_W)

    # ---- adaptive wing loss (elementwise) -----------------------------------
    delta = jnp.abs(pred - gt)
    expo = ALPHA - gt                                # alpha - gt, > 0 for heatmaps in [0,1]
    p = jnp.exp(expo * LOG_R)                        # (theta/eps)^(alpha-gt)
    pm1 = p * R_INV                                  # (theta/eps)^(alpha-gt-1)
    A = (OMEGA / EPSILON) * expo * pm1 / (1.0 + p)
    C = THETA * A - OMEGA * jnp.log(1.0 + p)
    # (delta/eps)^expo via exp(expo*log(.)); delta==0 -> exp(-inf)=0, matching
    # torch.pow since expo = alpha - gt > 0.
    small = OMEGA * jnp.log(1.0 + jnp.exp(expo * jnp.log(delta * (1.0 / EPSILON))))
    loss = jnp.where(delta < THETA, small, A * delta - C)
    if weight is not None:
        loss = loss * weight

    if n_planes % block_p:
        # Ragged last grid block: planes past n_planes are out-of-bounds
        # garbage -> select 0 (a where, not a multiply, so NaN cannot leak).
        plane = (pl.program_id(0) * block_p
                 + jax.lax.broadcasted_iota(jnp.int32, (block_p, 1), 0))
        loss = jnp.where(plane < n_planes, loss, 0.0)

    # Per-block partial sum broadcast into the (1,1,1) output block.
    psum_ref[...] = jnp.sum(loss) + jnp.zeros(psum_ref.shape, jnp.float32)


def awing_loss(output, groundtruth, block_planes=None):
    """output, groundtruth: (b, n, h, w) -> scalar mean AWing loss."""
    b, c, h, w = output.shape
    planes = b * c
    L = h * w
    total = planes * L

    # Lane-dense layout: contiguous (free) reshape to (planes, h*w).
    pred = output.reshape(planes, L)
    gt = groundtruth.reshape(planes, L)

    if block_planes is None:
        # ~512 KiB of f32 per input block: past the pipelining knee, while
        # 2 inputs x 2 pipeline buffers + ~10 block-sized f32 temporaries stay
        # well inside v5e's default scoped VMEM and v7x's 64 MiB/TC.
        # TODO(synk): for very large spatial maps (h*w*4 >> budget) an inner
        # fori_loop over lane chunks with a halo would bound VMEM further.
        budget_bytes = 512 * 1024
        P = min(planes, max(1, budget_bytes // (L * 4)), 512)
        # Prefer >= 2 grid steps when there is enough work (v7x megacore).
        if P == planes and planes >= 16:
            P = -(-planes // 2)
        # Sublane alignment: P must be a multiple of 8 or span all planes.
        if P != planes:
            P = max(8, (P // 8) * 8)
    else:
        P = int(block_planes)

    num_blocks = -(-planes // P)

    kernel = partial(_awing_kernel, width=w, n_planes=planes, block_p=P)

    partials = pl.pallas_call(
        kernel,
        out_shape=jax.ShapeDtypeStruct((num_blocks, 1, 1), jnp.float32),
        grid_spec=pltpu.PrefetchScalarGridSpec(
            num_scalar_prefetch=0,
            grid=(num_blocks,),
            in_specs=[
                pl.BlockSpec((P, L), lambda i: (i, 0)),
                pl.BlockSpec((P, L), lambda i: (i, 0)),
            ],
            out_specs=pl.BlockSpec((1, 1, 1), lambda i: (i, 0, 0)),
        ),
        compiler_params=pltpu.CompilerParams(
            dimension_semantics=("parallel",),
            vmem_limit_bytes=32 * 1024 * 1024),
    )(pred, gt)

    return jnp.sum(partials) / jnp.float32(total)


def awing_loss_ref(output, groundtruth):
    """Pure-JAX reference mirroring the PyTorch forward."""
    gt = groundtruth.astype(jnp.float32)
    pred = output.astype(jnp.float32)
    delta = jnp.abs(pred - gt)
    expo = ALPHA - gt
    p = jnp.power(THETA / EPSILON, expo)
    A = (OMEGA * (1.0 / (1.0 + p)) * expo *
         jnp.power(THETA / EPSILON, expo - 1.0) * (1.0 / EPSILON))
    C = THETA * A - OMEGA * jnp.log(1.0 + p)
    loss = jnp.where(delta < THETA,
                     OMEGA * jnp.log(1.0 + jnp.power(delta / EPSILON, expo)),
                     A * delta - C)
    if USE_WEIGHT_MAP:
        dilate = jax.lax.reduce_window(
            gt, -jnp.inf, jax.lax.max,
            window_dimensions=(1, 1, 3, 3), window_strides=(1, 1, 1, 1),
            padding=((0, 0), (0, 0), (1, 1), (1, 1)))
        weight = jnp.where(dilate < WMAP_THRESH, 0.0, 1.0) * WMAP_W + 1.0
        loss = loss * weight
    return jnp.mean(loss)


if __name__ == "__main__":
    key = jax.random.PRNGKey(0)
    k1, k2, k3, k4 = jax.random.split(key, 4)

    # Primary small config (b=2, n=4, 16x16 heatmaps) -- single block.
    B, N, H, W = 2, 4, 16, 16
    pred = jax.random.uniform(k1, (B, N, H, W), dtype=jnp.float32)
    gt = jax.random.uniform(k2, (B, N, H, W), dtype=jnp.float32)
    out = awing_loss(pred, gt)
    jax.block_until_ready(out)
    ref = awing_loss_ref(pred, gt)
    assert jnp.allclose(out, ref, rtol=1e-4, atol=1e-5), (out, ref)

    # Multi-block + ragged-tail path (planes=21 -> blocks of 8, 8, 5-masked).
    B2, N2 = 3, 7
    pred2 = jax.random.uniform(k3, (B2, N2, H, W), dtype=jnp.float32)
    gt2 = jax.random.uniform(k4, (B2, N2, H, W), dtype=jnp.float32)
    out2 = awing_loss(pred2, gt2)
    jax.block_until_ready(out2)
    ref2 = awing_loss_ref(pred2, gt2)
    assert jnp.allclose(out2, ref2, rtol=1e-4, atol=1e-5), (out2, ref2)

    print("KERNEL_OK")
</pallas_src>

<mosaic_0001>
module attributes {stable_mosaic.version = 11 : i64} {
  func.func @_awing_kernel(%arg0: i32, %arg1: memref<8x256xf32, #tpu.memory_space<vmem>>, %arg2: memref<8x256xf32, #tpu.memory_space<vmem>>, %arg3: memref<1x1x1xf32, #tpu.memory_space<vmem>>) attributes {dimension_semantics = [#tpu.dimension_semantics<parallel>], iteration_bounds = array<i64: 1>, scalar_prefetch = 0 : i64, scratch_operands = 0 : i64, tpu.core_type = #tpu.core_type<tc>, window_params = [{transform_indices = @transform_0, window_bounds = array<i64: 8, 256>}, {transform_indices = @transform_1, window_bounds = array<i64: 8, 256>}, {transform_indices = @transform_2, window_bounds = array<i64: 1, 1, 1>}]} {
    %c0 = arith.constant 0 : index
    %c0_0 = arith.constant 0 : index
    %0 = vector.load %arg1[%c0, %c0_0] : memref<8x256xf32, #tpu.memory_space<vmem>>, vector<8x256xf32>
    %c0_1 = arith.constant 0 : index
    %c0_2 = arith.constant 0 : index
    %1 = vector.load %arg2[%c0_1, %c0_2] : memref<8x256xf32, #tpu.memory_space<vmem>>, vector<8x256xf32>
    %2 = tpu.iota {dimensions = array<i32: 1>} : vector<1x256xi32>
    %3 = arith.sitofp %2 : vector<1x256xi32> to vector<1x256xf32>
    %cst = arith.constant 5.000000e-01 : f32
    %4 = vector.broadcast %cst : f32 to vector<1x256xf32>
    %5 = arith.addf %3, %4 : vector<1x256xf32>
    %cst_3 = arith.constant 6.250000e-02 : f32
    %6 = vector.broadcast %cst_3 : f32 to vector<1x256xf32>
    %7 = arith.mulf %5, %6 : vector<1x256xf32>
    %8 = math.floor %7 : vector<1x256xf32>
    %cst_4 = arith.constant 1.600000e+01 : f32
    %9 = vector.broadcast %cst_4 : f32 to vector<1x256xf32>
    %10 = arith.mulf %8, %9 : vector<1x256xf32>
    %11 = arith.subf %3, %10 : vector<1x256xf32>
    %cst_5 = arith.constant 5.000000e-01 : f32
    %12 = vector.broadcast %cst_5 : f32 to vector<1x256xf32>
    %13 = arith.cmpf ogt, %11, %12 : vector<1x256xf32>
    %cst_6 = arith.constant 1.450000e+01 : f32
    %14 = vector.broadcast %cst_6 : f32 to vector<1x256xf32>
    %15 = arith.cmpf olt, %11, %14 : vector<1x256xf32>
    %cst_7 = arith.constant 5.000000e-01 : f32
    %16 = vector.broadcast %cst_7 : f32 to vector<1x256xf32>
    %17 = arith.cmpf ogt, %8, %16 : vector<1x256xf32>
    %cst_8 = arith.constant 1.450000e+01 : f32
    %18 = vector.broadcast %cst_8 : f32 to vector<1x256xf32>
    %19 = arith.cmpf olt, %8, %18 : vector<1x256xf32>
    %c1_i32 = arith.constant 1 : i32
    %20 = tpu.dynamic_rotate %1 by %c1_i32 dim 1 : vector<8x256xf32>, i32 -> vector<8x256xf32>
    %cst_9 = arith.constant -3.000000e+38 : f32
    %21 = vector.shape_cast %13 : vector<1x256xi1> to vector<1x256xi1>
    %22 = vector.broadcast %21 : vector<1x256xi1> to vector<8x256xi1>
    %23 = vector.broadcast %cst_9 : f32 to vector<8x256xf32>
    %24 = arith.select %22, %20, %23 : vector<8x256xi1>, vector<8x256xf32>
    %c255_i32 = arith.constant 255 : i32
    %25 = tpu.dynamic_rotate %1 by %c255_i32 dim 1 : vector<8x256xf32>, i32 -> vector<8x256xf32>
    %cst_10 = arith.constant -3.000000e+38 : f32
    %26 = vector.shape_cast %15 : vector<1x256xi1> to vector<1x256xi1>
    %27 = vector.broadcast %26 : vector<1x256xi1> to vector<8x256xi1>
    %28 = vector.broadcast %cst_10 : f32 to vector<8x256xf32>
    %29 = arith.select %27, %25, %28 : vector<8x256xi1>, vector<8x256xf32>
    %30 = arith.maximumf %24, %29 : vector<8x256xf32>
    %31 = arith.maximumf %1, %30 : vector<8x256xf32>
    %c16_i32 = arith.constant 16 : i32
    %32 = tpu.dynamic_rotate %31 by %c16_i32 dim 1 : vector<8x256xf32>, i32 -> vector<8x256xf32>
    %cst_11 = arith.constant -3.000000e+38 : f32
    %33 = vector.shape_cast %17 : vector<1x256xi1> to vector<1x256xi1>
    %34 = vector.broadcast %33 : vector<1x256xi1> to vector<8x256xi1>
    %35 = vector.broadcast %cst_11 : f32 to vector<8x256xf32>
    %36 = arith.select %34, %32, %35 : vector<8x256xi1>, vector<8x256xf32>
    %c240_i32 = arith.constant 240 : i32
    %37 = tpu.dynamic_rotate %31 by %c240_i32 dim 1 : vector<8x256xf32>, i32 -> vector<8x256xf32>
    %cst_12 = arith.constant -3.000000e+38 : f32
    %38 = vector.shape_cast %19 : vector<1x256xi1> to vector<1x256xi1>
    %39 = vector.broadcast %38 : vector<1x256xi1> to vector<8x256xi1>
    %40 = vector.broadcast %cst_12 : f32 to vector<8x256xf32>
    %41 = arith.select %39, %37, %40 : vector<8x256xi1>, vector<8x256xf32>
    %42 = arith.maximumf %36, %41 : vector<8x256xf32>
    %43 = arith.maximumf %31, %42 : vector<8x256xf32>
    %cst_13 = arith.constant 2.000000e-01 : f32
    %44 = vector.broadcast %cst_13 : f32 to vector<8x256xf32>
    %45 = arith.cmpf olt, %43, %44 : vector<8x256xf32>
    %cst_14 = arith.constant 1.000000e+00 : f32
    %cst_15 = arith.constant 1.100000e+01 : f32
    %46 = vector.broadcast %cst_14 : f32 to vector<8x256xf32>
    %47 = vector.broadcast %cst_15 : f32 to vector<8x256xf32>
    %48 = arith.select %45, %46, %47 : vector<8x256xi1>, vector<8x256xf32>
    %49 = arith.subf %0, %1 : vector<8x256xf32>
    %50 = math.absf %49 : vector<8x256xf32>
    %cst_16 = arith.constant 2.100000e+00 : f32
    %51 = vector.broadcast %cst_16 : f32 to vector<8x256xf32>
    %52 = arith.subf %51, %1 : vector<8x256xf32>
    %cst_17 = arith.constant -0.693147182 : f32
    %53 = vector.broadcast %cst_17 : f32 to vector<8x256xf32>
    %54 = arith.mulf %52, %53 : vector<8x256xf32>
    %55 = math.exp %54 : vector<8x256xf32>
    %cst_18 = arith.constant 2.000000e+00 : f32
    %56 = vector.broadcast %cst_18 : f32 to vector<8x256xf32>
    %57 = arith.mulf %55, %56 : vector<8x256xf32>
    %cst_19 = arith.constant 1.400000e+01 : f32
    %58 = vector.broadcast %cst_19 : f32 to vector<8x256xf32>
    %59 = arith.mulf %58, %52 : vector<8x256xf32>
    %60 = arith.mulf %59, %57 : vector<8x256xf32>
    %cst_20 = arith.constant 1.000000e+00 : f32
    %61 = vector.broadcast %cst_20 : f32 to vector<8x256xf32>
    %62 = arith.addf %61, %55 : vector<8x256xf32>
    %63 = arith.divf %60, %62 : vector<8x256xf32>
    %cst_21 = arith.constant 5.000000e-01 : f32
    %64 = vector.broadcast %cst_21 : f32 to vector<8x256xf32>
    %65 = arith.mulf %64, %63 : vector<8x256xf32>
    %cst_22 = arith.constant 1.000000e+00 : f32
    %66 = vector.broadcast %cst_22 : f32 to vector<8x256xf32>
    %67 = arith.addf %66, %55 : vector<8x256xf32>
    %68 = math.log %67 : vector<8x256xf32>
    %cst_23 = arith.constant 1.400000e+01 : f32
    %69 = vector.broadcast %cst_23 : f32 to vector<8x256xf32>
    %70 = arith.mulf %69, %68 : vector<8x256xf32>
    %71 = arith.subf %65, %70 : vector<8x256xf32>
    %cst_24 = arith.constant 1.000000e+00 : f32
    %72 = vector.broadcast %cst_24 : f32 to vector<8x256xf32>
    %73 = arith.mulf %50, %72 : vector<8x256xf32>
    %74 = math.log %73 : vector<8x256xf32>
    %75 = arith.mulf %52, %74 : vector<8x256xf32>
    %76 = math.exp %75 : vector<8x256xf32>
    %cst_25 = arith.constant 1.000000e+00 : f32
    %77 = vector.broadcast %cst_25 : f32 to vector<8x256xf32>
    %78 = arith.addf %77, %76 : vector<8x256xf32>
    %79 = math.log %78 : vector<8x256xf32>
    %cst_26 = arith.constant 1.400000e+01 : f32
    %80 = vector.broadcast %cst_26 : f32 to vector<8x256xf32>
    %81 = arith.mulf %80, %79 : vector<8x256xf32>
    %cst_27 = arith.constant 5.000000e-01 : f32
    %82 = vector.broadcast %cst_27 : f32 to vector<8x256xf32>
    %83 = arith.cmpf olt, %50, %82 : vector<8x256xf32>
    %84 = arith.mulf %63, %50 : vector<8x256xf32>
    %85 = arith.subf %84, %71 : vector<8x256xf32>
    %86 = arith.select %83, %81, %85 : vector<8x256xi1>, vector<8x256xf32>
    %87 = arith.mulf %86, %48 : vector<8x256xf32>
    %88 = vector.shape_cast %87 : vector<8x256xf32> to vector<1x8x256xf32>
    %cst_28 = arith.constant dense<0.000000e+00> : vector<1xf32>
    %89 = vector.multi_reduction <add>, %88, %cst_28 [1, 2] : vector<1x8x256xf32> to vector<1xf32>
    %90 = vector.shape_cast %89 : vector<1xf32> to vector<1x1x1xf32>
    %91 = vector.extract %90[0, 0, 0] : f32 from vector<1x1x1xf32>
    %cst_29 = arith.constant 0.000000e+00 : f32
    %92 = vector.broadcast %cst_29 : f32 to vector<1x1x1xf32>
    %93 = vector.broadcast %91 : f32 to vector<1x1x1xf32>
    %94 = arith.addf %93, %92 : vector<1x1x1xf32>
    %c0_30 = arith.constant 0 : index
    %c0_31 = arith.constant 0 : index
    %c0_32 = arith.constant 0 : index
    %95 = vector.load %arg3[%c0_30, %c0_31, %c0_32] : memref<1x1x1xf32, #tpu.memory_space<vmem>>, vector<1x1x1xf32>
    tpu.vector_store %arg3[%c0_30, %c0_31, %c0_32], %94 {strides = array<i32>} : memref<1x1x1xf32, #tpu.memory_space<vmem>>, vector<1x1x1xf32>,
    return
  }
  func.func @transform_0(%arg0: i32) -> (i32, i32) {
    %c0_i32 = arith.constant 0 : i32
    %c0_i32_0 = arith.constant 0 : i32
    return %arg0, %c0_i32 : i32, i32
  }
  func.func @transform_1(%arg0: i32) -> (i32, i32) {
    %c0_i32 = arith.constant 0 : i32
    %c0_i32_0 = arith.constant 0 : i32
    return %arg0, %c0_i32 : i32, i32
  }
  func.func @transform_2(%arg0: i32) -> (i32, i32, i32) {
    %c0_i32 = arith.constant 0 : i32
    %c0_i32_0 = arith.constant 0 : i32
    %c0_i32_1 = arith.constant 0 : i32
    return %arg0, %c0_i32, %c0_i32_0 : i32, i32, i32
  }
}

</mosaic_0001>

<bundles_post_ra>
// kernel: tpu_custom_call.1
= control target key start
LH: loop header
LB: loop body
LE: loop exit
PB: predicated region body
PF: predicated region fallthrough
CT: control target
= control target key end

     0   :  { %7 = vsyncpa [#allocation3], 0  ;;  %s422_s0 = inlined_call_operand.hbm [shape: f32[8,256], index: 0, kind: input, shape index: {}]   ;;  %s423_s1 = inlined_call_operand.hbm [shape: f32[8,256], index: 1, kind: input, shape index: {}]   ;;  %s424_s2 = inlined_call_operand.hbm [shape: f32[1,1,1], index: 2, kind: output, shape index: {}]  }
   0x1   :  { %8 = vsyncpa [#allocation6], 0 }
   0x2   :  { %9 = vsyncpa [#allocation4], 0  ;;  %s325_s9 = smov [#allocation2]   ;;  %s326_s11 = smov [#allocation5]  }
   0x3   :  { %s16_s10 = sshll.u32 %s325_s9, 4  ;;  %s26_s12 = sshll.u32 %s326_s11, 4  ;;  %s17_s10 = int_to_ptr.vmem [resolvable:$true] %s16_s10  ;;  %s27_s12 = int_to_ptr.vmem [resolvable:$true] %s26_s12 }
   0x4   :  { %s253_s15 = scalar_lea.hbm %s422_s0, 256 }
   0x5   :  { %p254_p0 = scmp.ne.s32.totalorder %s422_s0, %s253_s15  ;;  %p257_p1 = scmp.lt.u32.totalorder %s253_s15, %s422_s0 }
   0x7   :  { %p259_p2 = pnand %p257_p1, %p254_p0 }
   0x9   :  { %262 = shalt.err (!%p259_p2)
}
   0xa   :  { %s263_s20 = scalar_lea.vmem %s17_s10, 256  ;;  %p268_p4 = scmp.lt.s32.totalorder %s17_s10, %s17_s10 }
   0xb   :  { %p264_p3 = scmp.ne.s32.totalorder %s17_s10, %s263_s20  ;;  %p269_p5 = scmp.lt.s32.totalorder %s263_s20, %s263_s20 }
   0xd   :  { %p270_p6 = por %p269_p5, %p268_p4 }
   0xf   :  { %p271_p7 = pnand %p270_p6, %p264_p3 }
  0x11   :  { %274 = shalt.err (!%p271_p7)
}
  0x12   :  { %19 = dma.hbm_to_vmem [thread:$0]  %s422_s0, 256, %s17_s10, [#allocation3]  }
  0x13   :  { %s275_s25 = scalar_lea.hbm %s423_s1, 256 }
  0x14   :  { %p276_p8 = scmp.ne.s32.totalorder %s423_s1, %s275_s25  ;;  %p279_p9 = scmp.lt.u32.totalorder %s275_s25, %s423_s1 }
  0x16   :  { %p281_p10 = pnand %p279_p9, %p276_p8 }
  0x18   :  { %284 = shalt.err (!%p281_p10)
}
  0x19   :  { %s285_s30 = scalar_lea.vmem %s27_s12, 256  ;;  %p290_p12 = scmp.lt.s32.totalorder %s27_s12, %s27_s12 }
  0x1a   :  { %p286_p11 = scmp.ne.s32.totalorder %s27_s12, %s285_s30  ;;  %p291_p13 = scmp.lt.s32.totalorder %s285_s30, %s285_s30 }
  0x1c   :  { %p292_p0 = por %p291_p13, %p290_p12 }
  0x1e   :  { %p293_p1 = pnand %p292_p0, %p286_p11 }
  0x20   :  { %296 = shalt.err (!%p293_p1)
}
  0x21   :  { %29 = dma.hbm_to_vmem [thread:$0]  %s423_s1, 256, %s27_s12, [#allocation6]  }
  0x22   :  { %319 = dma.done.wait [#allocation3], 256  }
  0x23   :  { %320 = vsyncadd [#allocation3], 4294967040 }
  0x24   :  { %321 = dma.done.wait [#allocation6], 256  }
  0x25   :  { %322 = vsyncadd [#allocation6], 4294967040  ;;  %v38_v0 = vld [vmem:[#allocation5] sm:$0xff]  ;;  %s327_s4 = smov 127   ;;  %s328_s5 = smov 1   ;;  %v39_v1 = vld [vmem:[#allocation5 + $0x8] sm:$0xff]  ;;  %v40_v2 = vlaneseq }
  0x26   :  { %76 = vrot.lane.b32.xlu1 %v38_v0, %s327_s4  ;;  %63 = vrot.lane.b32.xlu0 %v38_v0, %s328_s5  ;;  %s329_s1 = smov 16   ;;  %s330_s6 = smov 112   ;;  %v36_v33 = vld [vmem:[#allocation2] sm:$0xff]  ;;  %v37_v34 = vld [vmem:[#allocation2 + $0x8] sm:$0xff]  ;;  %v131_v39 = vsub.f32 2.1, %v38_v0 }
  0x27   :  { %v372_v3 = vand.u32 127, %v40_v2  ;;  %v127_v35 = vsub.f32 %v36_v33, %v38_v0  ;;  %v128_v36 = vsub.f32 %v37_v34, %v39_v1  ;;  %v132_v40 = vsub.f32 2.1, %v39_v1  ;;  %s332_s7 = smov [#allocation7]  }
  0x28   :  { %v133_v41 = vmul.f32 -0.6931472, %v131_v39  ;;  %v141_v61 = vmul.f32 14.0, %v131_v39  ;;  %s209_s8 = sshll.u32 %s332_s7, 4  ;;  %s210_s8 = int_to_ptr.vmem [resolvable:$true] %s209_s8 }
  0x29   :  { %v42_v4 = vadd.s32 128, %v372_v3  ;;  %v43_v5 = vcvt.s32.f32 %v372_v3  ;;  %vm80_vm0 = vcmp.lt.s32.totalorder %v372_v3, 127  ;;  %vm67_vm1 = vcmp.lt.s32.totalorder %v372_v3, 1  ;;  %s297_s10 = scalar_lea.vmem %s210_s8, 16  ;;  %s301_s11 = scalar_lea.vmem %s210_s8, 32 }
  0x2a   :  { %78 = vrot.lane.b32.xlu1 %v39_v1, %s327_s4  ;;  %65 = vrot.lane.b32.xlu0 %v39_v1, %s328_s5  ;;  %v392_v37 = vand.u32 2147483647, %v127_v35  ;;  %v394_v38 = vand.u32 2147483647, %v128_v36  ;;  %v134_v43 = vmul.f32 -0.6931472, %v132_v40  ;;  %p298_p2 = scmp.ne.s32.totalorder %s210_s8, %s297_s10  ;;  %p302_p3 = scmp.lt.s32.totalorder %s210_s8, %s210_s8 }
  0x2b   :  { %v44_v6 = vcvt.s32.f32 %v42_v4  ;;  %v45_v7 = vadd.f32 0.5, %v43_v5  ;;  %v135_v45 = vmul.f32 1.442695, %v133_v41  ;;  %v142_v63 = vmul.f32 14.0, %v132_v40  ;;  %p303_p4 = scmp.lt.s32.totalorder %s301_s11, %s297_s10 }
  0x2c   :  { %229 = vlog2.f32 %v392_v37  ;;  %v137_v47 = vmul.f32 1.442695, %v134_v43  ;;  %vm97_vm6 = vcmp.lt.s32.totalorder %v372_v3, 16  ;;  %vm110_vm8 = vcmp.lt.s32.totalorder %v372_v3, 112 }
  0x2d   :  { %v46_v8 = vadd.f32 0.5, %v44_v6  ;;  %v47_v9 = vmul.f32 0.0625, %v45_v7  ;;  %231 = vlog2.f32 %v394_v38  ;;  %vm179_vm12 = vcmp.lt.f32.partialorder %v392_v37, 0.5  ;;  %p304_p5 = por %p303_p4, %p302_p3 }
  0x2e   :  { %233 = vpow2.f32 %v135_v45  ;;  %vm180_vm13 = vcmp.lt.f32.partialorder %v394_v38, 0.5 }
  0x2f   :  { %v48_v10 = vmul.f32 0.0625, %v46_v8  ;;  %v376_v11 = vfloor.f32 %v47_v9  ;;  %235 = vpow2.f32 %v137_v47  ;;  %p305_p6 = pnand %p304_p5, %p298_p2 }
  0x31   :  { %v378_v12 = vfloor.f32 %v48_v10  ;;  %v51_v13 = vmul.f32 16.0, %v376_v11  ;;  %vm59_vm7 = vcmp.gt.f32.partialorder %v376_v11, 0.5  ;;  %vm61_vm10 = vcmp.lt.f32.partialorder %v376_v11, 14.5 }
  0x33   :  { %v52_v14 = vmul.f32 16.0, %v378_v12  ;;  %v53_v15 = vsub.f32 %v43_v5, %v51_v13  ;;  %vm60_vm9 = vcmp.gt.f32.partialorder %v378_v12, 0.5  ;;  %vm62_vm11 = vcmp.lt.f32.partialorder %v378_v12, 14.5 }
  0x35   :  { %v54_v16 = vsub.f32 %v44_v6, %v52_v14  ;;  %vm57_vm2 = vcmp.lt.f32.partialorder %v53_v15, 14.5  ;;  %vm55_vm4 = vcmp.gt.f32.partialorder %v53_v15, 0.5 }
  0x36   :  { %v230_v42 = vpop.eup %229 }
  0x37   :  { %vm58_vm3 = vcmp.lt.f32.partialorder %v54_v16, 14.5  ;;  %vm56_vm5 = vcmp.gt.f32.partialorder %v54_v16, 0.5  ;;  %v232_v44 = vpop.eup %231  ;;  %v162_v46 = vmul.f32 0.6931472, %v230_v42 }
  0x38   :  { %v164_v48 = vmul.f32 0.6931472, %v232_v44  ;;  %v234_v53 = vpop.eup %233 }
  0x39   :  { %v165_v49 = vmul.f32 %v162_v46, %v131_v39  ;;  %v236_v54 = vpop.eup %235  ;;  %v145_v55 = vadd.f32 1.0, %v234_v53  ;;  %v139_v62 = vmul.f32 2.0, %v234_v53 }
  0x3a   :  { %v166_v50 = vmul.f32 %v164_v48, %v132_v40  ;;  %v146_v56 = vadd.f32 1.0, %v236_v54 }
  0x3b   :  { %v167_v51 = vmul.f32 1.442695, %v165_v49  ;;  %v143_v4 = vmul.f32 %v141_v61, %v139_v62  ;;  %v331_v49 = vmov 11.0  }
  0x3c   :  { %v169_v52 = vmul.f32 1.442695, %v166_v50 }
  0x3d   :  { %237 = vpow2.f32 %v167_v51 }
  0x3e   :  { %239 = vpow2.f32 %v169_v52 }
  0x3f   :  { %241 = vrcp.f32 %v145_v55 }
  0x40   :  { %243 = vrcp.f32 %v146_v56 }
  0x41   :  { %245 = vlog2.f32 %v145_v55 }
  0x42   :  { %247 = vlog2.f32 %v146_v56 }
  0x47   :  { %v238_v57 = vpop.eup %237 }
  0x48   :  { %v240_v58 = vpop.eup %239  ;;  %v171_v59 = vadd.f32 1.0, %v238_v57 }
  0x49   :  { %v172_v60 = vadd.f32 1.0, %v240_v58 }
  0x4a   :  { %249 = vlog2.f32 %v171_v59 }
  0x4b   :  { %251 = vlog2.f32 %v172_v60 }
  0x98   :  { %v77_v17 = vpop.permute.xlu1 %76  ;;  %v64_v18 = vpop.permute.xlu0 %63 }
  0x9c   :  { %v79_v19 = vpop.permute.xlu1 %78  ;;  %v66_v20 = vpop.permute.xlu0 %65 }
  0x9d   :  { %v81_v21 = vsel %vm80_vm0, %v77_v17, %v79_v19  ;;  %v82_v22 = vsel %vm80_vm0, %v79_v19, %v77_v17  ;;  %v68_v23 = vsel %vm67_vm1, %v64_v18, %v66_v20  ;;  %v69_v24 = vsel %vm67_vm1, %v66_v20, %v64_v18 }
  0x9e   :  { %v87_v25 = vsel %vm57_vm2, %v81_v21, -3e+38  ;;  %v88_v26 = vsel %vm58_vm3, %v82_v22, -3e+38  ;;  %v74_v27 = vsel %vm55_vm4, %v69_v24, -3e+38 }
  0x9f   :  { %v75_v28 = vsel %vm56_vm5, %v68_v23, -3e+38  ;;  %v89_v29 = vmax.f32 %v74_v27, %v87_v25  ;;  %vm201_vm0 = vcmask 0  }
  0xa0   :  { %v90_v30 = vmax.f32 %v75_v28, %v88_v26 }
  0xa1   :  { %v384_v31 = vmax.f32 %v38_v0, %v89_v29  ;;  %v140_v0 = vmul.f32 2.0, %v236_v54 }
  0xa2   :  { %v386_v32 = vmax.f32 %v39_v1, %v90_v30  ;;  %v242_v1 = vpop.eup %241 }
  0xa3   :  { %93 = vrot.lane.b32.xlu0 %v384_v31, %s329_s1  ;;  %v244_v2 = vpop.eup %243  ;;  %v144_v6 = vmul.f32 %v142_v63, %v140_v0  ;;  %v148_v8 = vmul.f32 %v242_v1, %v143_v4 }
  0xa4   :  { %95 = vrot.lane.b32.xlu1 %v386_v32, %s329_s1  ;;  %v246_v5 = vpop.eup %245 }
  0xa5   :  { %v248_v7 = vpop.eup %247  ;;  %v154_v9 = vmul.f32 0.6931472, %v246_v5  ;;  %v150_v10 = vmul.f32 %v244_v2, %v144_v6  ;;  %v151_v16 = vmul.f32 0.5, %v148_v8  ;;  %v181_v25 = vmul.f32 %v148_v8, %v392_v37 }
  0xa6   :  { %v156_v13 = vmul.f32 0.6931472, %v248_v7  ;;  %v250_v14 = vpop.eup %249 }
  0xa7   :  { %106 = vrot.lane.b32.xlu0 %v384_v31, %s330_s6  ;;  %v252_v15 = vpop.eup %251  ;;  %v157_v17 = vmul.f32 14.0, %v154_v9  ;;  %v152_v18 = vmul.f32 0.5, %v150_v10  ;;  %v174_v22 = vmul.f32 0.6931472, %v250_v14  ;;  %v182_v28 = vmul.f32 %v150_v10, %v394_v38 }
  0xa8   :  { %108 = vrot.lane.b32.xlu1 %v386_v32, %s330_s6  ;;  %v158_v19 = vmul.f32 14.0, %v156_v13  ;;  %v176_v23 = vmul.f32 0.6931472, %v252_v15 }
  0xa9   :  { %v159_v24 = vsub.f32 %v151_v16, %v157_v17  ;;  %v177_v34 = vmul.f32 14.0, %v174_v22 }
  0xaa   :  { %v160_v27 = vsub.f32 %v152_v18, %v158_v19  ;;  %v178_v35 = vmul.f32 14.0, %v176_v23 }
  0xab   :  { %v183_v41 = vsub.f32 %v181_v25, %v159_v24 }
  0xac   :  { %v184_v44 = vsub.f32 %v182_v28, %v160_v27 }
  0xad   :  { %v185_v47 = vsel %vm179_vm12, %v177_v34, %v183_v41 }
  0xae   :  { %v186_v48 = vsel %vm180_vm13, %v178_v35, %v184_v44 }
 0x115   :  { %v94_v20 = vpop.permute.xlu0 %93 }
 0x116   :  { %v96_v21 = vpop.permute.xlu1 %95 }
 0x117   :  { %v99_v26 = vsel %vm97_vm6, %v96_v21, %v94_v20  ;;  %v98_v29 = vsel %vm97_vm6, %v94_v20, %v96_v21 }
 0x118   :  { %v104_v36 = vsel %vm59_vm7, %v99_v26, -3e+38  ;;  %v105_v42 = vsel %vm60_vm9, %v98_v29, -3e+38 }
 0x119   :  { %v107_v30 = vpop.permute.xlu0 %106 }
 0x11a   :  { %v109_v33 = vpop.permute.xlu1 %108 }
 0x11b   :  { %v111_v39 = vsel %vm110_vm8, %v107_v30, %v109_v33  ;;  %v112_v40 = vsel %vm110_vm8, %v109_v33, %v107_v30 }
 0x11c   :  { %v117_v3 = vsel %vm61_vm10, %v111_v39, -3e+38  ;;  %v118_v43 = vsel %vm62_vm11, %v112_v40, -3e+38 }
 0x11d   :  { %v119_v45 = vmax.f32 %v104_v36, %v117_v3  ;;  %v120_v46 = vmax.f32 %v105_v42, %v118_v43 }
 0x11f   :  { %v121_v11 = vmax.f32 %v384_v31, %v119_v45  ;;  %v122_v12 = vmax.f32 %v386_v32, %v120_v46 }
 0x121   :  { %vm123_vm14 = vcmp.lt.f32.partialorder %v121_v11, 0.2  ;;  %vm124_vm15 = vcmp.lt.f32.partialorder %v122_v12, 0.2 }
 0x122   :  { %v125_v50 = vsel %vm123_vm14, 1.0, %v331_v49  ;;  %v126_v51 = vsel %vm124_vm15, 1.0, %v331_v49 }
 0x123   :  { %v187_v52 = vmul.f32 %v185_v47, %v125_v50  ;;  %v188_v53 = vmul.f32 %v186_v48, %v126_v51 }
 0x125   :  { %v189_v54 = vadd.f32 %v188_v53, %v187_v52 }
 0x127   :  { %190 = vadd.xlane.f32.xlu0 %v189_v54 }
 0x1b4   :  { %v191_v55 = vpop.xlane.xlu0 %190 }
 0x1b5   :  { %v192_v56 = vrot.slane %v191_v55, 4 }
 0x1b7   :  { %v193_v37 = vadd.f32 %v192_v56, %v191_v55 }
 0x1b9   :  { %v194_v57 = vrot.slane %v193_v37, 2 }
 0x1bb   :  { %v195_v38 = vadd.f32 %v194_v57, %v193_v37 }
 0x1bd   :  { %v196_v58 = vrot.slane %v195_v38, 1 }
 0x1bf   :  { %v197_v31 = vadd.f32 %v196_v58, %v195_v38 }
 0x1c1   :  { %219 = vpush %v197_v31 }
 0x1f2   :  { %s220_s9 = spop %219 }
 0x1f3   :  { %v199_v32 = vstv %s220_s9 }
 0x1f4   :  { %202 = vst.msk [vmem:[#allocation7] sm:$0x1] %vm201_vm0, %v199_v32 }
 0x1f5   :  { %308 = shalt.err (!%p305_p6)
}
 0x1f6   :  { %s309_s14 = scalar_lea.hbm %s424_s2, 16 }
 0x1f7   :  { %p310_p7 = scmp.ne.s32.totalorder %s424_s2, %s309_s14  ;;  %p313_p8 = scmp.lt.u32.totalorder %s309_s14, %s424_s2 }
 0x1f9   :  { %p315_p9 = pnand %p313_p8, %p310_p7 }
 0x1fb   :  { %318 = shalt.err (!%p315_p9)
}
 0x1fc   :  { %212 = dma.vmem_to_hbm [thread:$0]  %s210_s8, 16, %s424_s2, [#allocation4]  }
 0x1fd   :  { %323 = dma.done.wait [#allocation4], 16  }
 0x1fe   :  { %324 = vsyncadd [#allocation4], 4294967280 }
 0x1ff   :  { %216 = vsyncpa [#allocation3], 1 }
 0x200   :  { %217 = vsyncpa [#allocation6], 1 }
 0x201   :  { %218 = vsyncpa [#allocation4], 1 }

</bundles_post_ra>
